<compile_context>
chip_gen: v6e
topology: v6e:2x2x1
jax: 0.10.0
libtpu: 0.0.40
codegen_flags: <defaults>
</compile_context>

<pallas_src>
import functools

import jax
import jax.numpy as jnp
import numpy as np
from jax.experimental import pallas as pl
from jax.experimental.pallas import tpu as pltpu

# ---- module hyper-parameters (ASLSingleLabel.__init__ defaults) -------------
GAMMA_POS = 0.0
GAMMA_NEG = 4.0
EPS = 0.1
REDUCTION = "mean"   # only 'mean' is implemented (module default)


def _round_up(x, m):
    return ((x + m - 1) // m) * m


def _static_pow(base, gamma):
    """base ** gamma. Small non-negative integer gammas lower to VALU multiplies
    (repeated squaring). Returns None when the result is identically 1."""
    g = float(gamma)
    gi = int(round(g))
    if abs(g - gi) < 1e-12 and 0 <= gi <= 16:
        if gi == 0:
            return None
        result = None
        acc = base
        n = gi
        while n:
            if n & 1:
                result = acc if result is None else result * acc
            n >>= 1
            if n:
                acc = acc * acc
        return result
    return base ** g   # non-integer gamma: falls back to EUP log/exp pow


def _asl_kernel(logits_ref, target_ref, out_ref, *,
                gamma_pos, gamma_neg, eps, num_classes, batch_size,
                block_rows, mask_rows):
    x = logits_ref[...].astype(jnp.float32)            # (TB, C) compute in f32
    tgt = target_ref[...]                              # (TB, 1) int32
    tb, c = x.shape

    class_ids = jax.lax.broadcasted_iota(jnp.int32, (tb, c), 1)
    is_target = class_ids == tgt                       # (TB, C)

    row_valid = None
    if mask_rows:
        # The last (partial) batch block reads past B: those rows hold
        # uninitialized data and MUST be neutralized before max/exp so that no
        # NaN/Inf can survive into the partial sum via NaN * 0.
        row_ids = pl.program_id(0) * block_rows + jax.lax.broadcasted_iota(
            jnp.int32, (tb, 1), 0)
        row_valid = row_ids < batch_size               # (TB, 1) bool
        x = jnp.where(row_valid, x, 0.0)

    # --- log-softmax over the class axis (single exp pass) -------------------
    m = jnp.max(x, axis=-1, keepdims=True)
    z = x - m
    ez = jnp.exp(z)                                    # EUP, once per element
    denom = jnp.sum(ez, axis=-1, keepdims=True)        # (TB, 1)
    log_preds = z - jnp.log(denom)                     # (TB, C)
    p = ez * (1.0 / denom)                             # softmax probs, per-row divide

    # --- fused asymmetric-focusing + label-smoothing weight ------------------
    #   target lane:     (1 - eps + eps/C) * (1 - p)^gamma_pos
    #   non-target lane: (eps/C)           *  p     ^gamma_neg
    on_w = (1.0 - eps) + eps / num_classes
    off_w = eps / num_classes
    w_pos = _static_pow(1.0 - p, gamma_pos)   # None -> identically 1 (gamma_pos=0)
    w_neg = _static_pow(p, gamma_neg)         # gamma_neg=4 -> two multiplies
    pos_term = on_w if w_pos is None else on_w * w_pos
    neg_term = off_w if w_neg is None else off_w * w_neg
    weight = jnp.where(is_target, pos_term, neg_term)

    # --- per-row loss, masked partial sum for this batch block ---------------
    loss_rows = -jnp.sum(weight * log_preds, axis=-1, keepdims=True)   # (TB, 1)
    if row_valid is not None:
        loss_rows = jnp.where(row_valid, loss_rows, 0.0)
    out_ref[...] = jnp.sum(loss_rows).reshape(1, 1, 1)


def asl_single_label_loss(inputs, target,
                          gamma_pos=GAMMA_POS, gamma_neg=GAMMA_NEG, eps=EPS,
                          block_rows=None):
    """inputs: (B, C) float (f32/bf16); target: (B,) int. Returns scalar mean loss."""
    B, C = inputs.shape
    in_dtype = inputs.dtype
    itemsize = jnp.dtype(in_dtype).itemsize
    c_lanes = _round_up(max(C, 128), 128)   # lane footprint of the in-kernel f32 temps

    if block_rows is None:
        # Size the tile from the in-kernel f32 working set (~6 live (TB,C) f32
        # temps) plus the double-buffered native-dtype input block. ~16 MiB
        # budget keeps it comfortably inside every generation's VMEM
        # (including v7x's 64 MiB physical / 32 MiB scoped default).
        budget_bytes = 16 * 1024 * 1024
        bytes_per_row = c_lanes * (6 * 4 + 2 * 2 * itemsize)
        block_rows = budget_bytes // max(bytes_per_row, 1)
        block_rows = max(8, min(1024, (block_rows // 8) * 8))
    # Guarantee >= 2 grid blocks whenever possible so both v7x TensorCores get
    # work from the "parallel" batch axis.
    if B > 8:
        block_rows = min(block_rows, max(8, _round_up((B + 1) // 2, 8)))
    block_rows = min(block_rows, _round_up(B, 8))
    block_rows = max(8, (block_rows // 8) * 8)

    num_blocks = -(-B // block_rows)          # cdiv
    mask_rows = (B % block_rows) != 0

    target2d = target.astype(jnp.int32).reshape(B, 1)

    kernel = functools.partial(
        _asl_kernel, gamma_pos=gamma_pos, gamma_neg=gamma_neg, eps=eps,
        num_classes=C, batch_size=B, block_rows=block_rows, mask_rows=mask_rows)

    cost = pl.CostEstimate(
        flops=12 * B * C,
        transcendentals=B * C + 2 * B,
        bytes_accessed=B * C * itemsize + B * 4 + num_blocks * 4)

    partials = pl.pallas_call(
        kernel,
        out_shape=jax.ShapeDtypeStruct((num_blocks, 1, 1), jnp.float32),
        grid=(num_blocks,),
        in_specs=[
            pl.BlockSpec((block_rows, C), lambda i: (i, 0)),   # last dim = full C extent
            pl.BlockSpec((block_rows, 1), lambda i: (i, 0)),
        ],
        out_specs=pl.BlockSpec((1, 1, 1), lambda i: (i, 0, 0)),
        compiler_params=pltpu.CompilerParams(
            dimension_semantics=("parallel",),
            vmem_limit_bytes=32 * 1024 * 1024),
        cost_estimate=cost,
    )(inputs, target2d)

    # reduction == 'mean': tiny final reduction done in plain XLA.
    return jnp.sum(partials) / B


def _reference_loss(inputs, target, gamma_pos=GAMMA_POS, gamma_neg=GAMMA_NEG,
                    eps=EPS):
    """Pure-JAX reference mirroring the PyTorch forward."""
    B, C = inputs.shape
    log_preds = jax.nn.log_softmax(inputs.astype(jnp.float32), axis=-1)
    targets = jax.nn.one_hot(target, C, dtype=jnp.float32)
    anti = 1.0 - targets
    xs_pos = jnp.exp(log_preds) * targets
    xs_neg = (1.0 - jnp.exp(log_preds)) * anti
    base = 1.0 - xs_pos - xs_neg
    w = jnp.where(targets > 0, base ** gamma_pos, base ** gamma_neg)
    lp = log_preds * w
    tc = targets * (1.0 - eps) + eps / C
    return jnp.mean(-jnp.sum(tc * lp, axis=-1))


if __name__ == "__main__":
    key = jax.random.PRNGKey(0)
    k1, k2, k3, k4, k5, k6 = jax.random.split(key, 6)

    # Case 1: module-sized test (batch_size=8, number_classes=32), f32, single block.
    B, C = 8, 32
    inputs = jax.random.normal(k1, (B, C), dtype=jnp.float32)
    target = jax.random.randint(k2, (B,), 0, C, dtype=jnp.int32)
    loss = jax.block_until_ready(asl_single_label_loss(inputs, target))
    ref = jax.block_until_ready(_reference_loss(inputs, target))
    assert np.allclose(np.asarray(loss), np.asarray(ref), rtol=1e-5, atol=1e-5), (loss, ref)

    # Case 2: ragged shapes (unaligned C, partial last batch block, multiple blocks),
    # no wrapper-side padding anywhere.
    B2, C2 = 40, 100
    inputs2 = jax.random.normal(k3, (B2, C2), dtype=jnp.float32)
    target2 = jax.random.randint(k4, (B2,), 0, C2, dtype=jnp.int32)
    loss2 = jax.block_until_ready(
        asl_single_label_loss(inputs2, target2, block_rows=16))
    ref2 = jax.block_until_ready(_reference_loss(inputs2, target2))
    assert np.allclose(np.asarray(loss2), np.asarray(ref2), rtol=1e-5, atol=1e-5), (loss2, ref2)

    # Case 3: default block_rows heuristic on a small odd batch (exercises the
    # >=2-block clamp plus the in-kernel partial-row masking).
    B3, C3 = 10, 100
    inputs3 = jax.random.normal(k5, (B3, C3), dtype=jnp.float32)
    target3 = jax.random.randint(k6, (B3,), 0, C3, dtype=jnp.int32)
    loss3 = jax.block_until_ready(asl_single_label_loss(inputs3, target3))
    ref3 = jax.block_until_ready(_reference_loss(inputs3, target3))
    assert np.allclose(np.asarray(loss3), np.asarray(ref3), rtol=1e-5, atol=1e-5), (loss3, ref3)

    # Case 4: bf16 input path (DMA in bf16, math in f32 inside the kernel).
    loss_bf16 = jax.block_until_ready(
        asl_single_label_loss(inputs.astype(jnp.bfloat16), target))
    assert np.isfinite(np.asarray(loss_bf16)).all()
    assert np.allclose(np.asarray(loss_bf16), np.asarray(ref), rtol=5e-2, atol=5e-2)

    print("KERNEL_OK")
</pallas_src>

<mosaic_0001>
module attributes {stable_mosaic.version = 11 : i64} {
  func.func @_asl_kernel(%arg0: i32, %arg1: memref<8x32xf32, #tpu.memory_space<vmem>>, %arg2: memref<8x1xi32, #tpu.memory_space<vmem>>, %arg3: memref<1x1x1xf32, #tpu.memory_space<vmem>>) attributes {dimension_semantics = [#tpu.dimension_semantics<parallel>], iteration_bounds = array<i64: 1>, scalar_prefetch = 0 : i64, scratch_operands = 0 : i64, tpu.core_type = #tpu.core_type<tc>, window_params = [{transform_indices = @transform_0, window_bounds = array<i64: 8, 32>}, {transform_indices = @transform_1, window_bounds = array<i64: 8, 1>}, {transform_indices = @transform_2, window_bounds = array<i64: 1, 1, 1>}]} {
    %c0 = arith.constant 0 : index
    %c0_0 = arith.constant 0 : index
    %0 = vector.load %arg1[%c0, %c0_0] : memref<8x32xf32, #tpu.memory_space<vmem>>, vector<8x32xf32>
    %c0_1 = arith.constant 0 : index
    %c0_2 = arith.constant 0 : index
    %1 = vector.load %arg2[%c0_1, %c0_2] : memref<8x1xi32, #tpu.memory_space<vmem>>, vector<8x1xi32>
    %2 = tpu.iota {dimensions = array<i32: 1>} : vector<8x32xi32>
    %3 = vector.broadcast %1 : vector<8x1xi32> to vector<8x32xi32>
    %4 = arith.cmpi eq, %2, %3 : vector<8x32xi32>
    %cst = arith.constant dense<0xFF800000> : vector<8xf32>
    %5 = vector.multi_reduction <maximumf>, %0, %cst [1] : vector<8x32xf32> to vector<8xf32>
    %6 = vector.shape_cast %5 : vector<8xf32> to vector<8x1xf32>
    %7 = vector.broadcast %6 : vector<8x1xf32> to vector<8x32xf32>
    %8 = arith.subf %0, %7 : vector<8x32xf32>
    %9 = math.exp %8 : vector<8x32xf32>
    %cst_3 = arith.constant dense<0.000000e+00> : vector<8xf32>
    %10 = vector.multi_reduction <add>, %9, %cst_3 [1] : vector<8x32xf32> to vector<8xf32>
    %11 = vector.shape_cast %10 : vector<8xf32> to vector<8x1xf32>
    %12 = math.log %11 : vector<8x1xf32>
    %13 = vector.broadcast %12 : vector<8x1xf32> to vector<8x32xf32>
    %14 = arith.subf %8, %13 : vector<8x32xf32>
    %cst_4 = arith.constant 1.000000e+00 : f32
    %15 = vector.broadcast %cst_4 : f32 to vector<8x1xf32>
    %16 = arith.divf %15, %11 : vector<8x1xf32>
    %17 = vector.broadcast %16 : vector<8x1xf32> to vector<8x32xf32>
    %18 = arith.mulf %9, %17 : vector<8x32xf32>
    %19 = arith.mulf %18, %18 : vector<8x32xf32>
    %20 = arith.mulf %19, %19 : vector<8x32xf32>
    %cst_5 = arith.constant 3.125000e-03 : f32
    %21 = vector.broadcast %cst_5 : f32 to vector<8x32xf32>
    %22 = arith.mulf %21, %20 : vector<8x32xf32>
    %cst_6 = arith.constant 0.903124988 : f32
    %23 = vector.broadcast %cst_6 : f32 to vector<8x32xf32>
    %24 = arith.select %4, %23, %22 : vector<8x32xi1>, vector<8x32xf32>
    %25 = arith.mulf %24, %14 : vector<8x32xf32>
    %cst_7 = arith.constant dense<0.000000e+00> : vector<8xf32>
    %26 = vector.multi_reduction <add>, %25, %cst_7 [1] : vector<8x32xf32> to vector<8xf32>
    %27 = vector.shape_cast %26 : vector<8xf32> to vector<8x1xf32>
    %cst_8 = arith.constant 0.000000e+00 : f32
    %28 = vector.broadcast %cst_8 : f32 to vector<8x1xf32>
    %29 = arith.subf %28, %27 : vector<8x1xf32>
    %30 = vector.shape_cast %29 : vector<8x1xf32> to vector<1x8x1xf32>
    %cst_9 = arith.constant dense<0.000000e+00> : vector<1xf32>
    %31 = vector.multi_reduction <add>, %30, %cst_9 [1, 2] : vector<1x8x1xf32> to vector<1xf32>
    %32 = vector.shape_cast %31 : vector<1xf32> to vector<1x1x1xf32>
    %33 = vector.extract %32[0, 0, 0] : f32 from vector<1x1x1xf32>
    %34 = vector.broadcast %33 : f32 to vector<1x1x1xf32>
    %c0_10 = arith.constant 0 : index
    %c0_11 = arith.constant 0 : index
    %c0_12 = arith.constant 0 : index
    %35 = vector.load %arg3[%c0_10, %c0_11, %c0_12] : memref<1x1x1xf32, #tpu.memory_space<vmem>>, vector<1x1x1xf32>
    tpu.vector_store %arg3[%c0_10, %c0_11, %c0_12], %34 {strides = array<i32>} : memref<1x1x1xf32, #tpu.memory_space<vmem>>, vector<1x1x1xf32>,
    return
  }
  func.func @transform_0(%arg0: i32) -> (i32, i32) {
    %c0_i32 = arith.constant 0 : i32
    %c0_i32_0 = arith.constant 0 : i32
    return %arg0, %c0_i32 : i32, i32
  }
  func.func @transform_1(%arg0: i32) -> (i32, i32) {
    %c0_i32 = arith.constant 0 : i32
    %c0_i32_0 = arith.constant 0 : i32
    return %arg0, %c0_i32 : i32, i32
  }
  func.func @transform_2(%arg0: i32) -> (i32, i32, i32) {
    %c0_i32 = arith.constant 0 : i32
    %c0_i32_0 = arith.constant 0 : i32
    %c0_i32_1 = arith.constant 0 : i32
    return %arg0, %c0_i32, %c0_i32_0 : i32, i32, i32
  }
}

</mosaic_0001>

<bundles_post_ra>
// kernel: tpu_custom_call.1
= control target key start
LH: loop header
LB: loop body
LE: loop exit
PB: predicated region body
PF: predicated region fallthrough
CT: control target
= control target key end

     0   :  { %vm20_vm0 = vcmask 261120   ;;  %s136_s0 = inlined_call_operand.vmem [shape: f32[8,32], index: 0, kind: input, shape index: {}]   ;;  %s137_s1 = inlined_call_operand.vmem [shape: s32[8,1], index: 1, kind: input, shape index: {}]   ;;  %s138_s2 = inlined_call_operand.hbm [shape: f32[1,1,1], index: 2, kind: output, shape index: {}]  }
   0x1   :  { %v12_v0 = vld [vmem:[%s136_s0] sm:$0xff] }
   0x2   :  { %7 = vsyncpa [#allocation3], 0  ;;  %v21_v1 = vsel %vm20_vm0, %v12_v0, -inf  ;;  %v13_v2 = vld [vmem:[%s137_s1] sm:$0xff]  ;;  %v107_v3 = vmov 0   ;;  %v14_v10 = vlaneseq  ;;  %vm45_vm2 = vcmask 7168  }
   0x3   :  { %22 = vmax.xlane.f32.xlu0 %v21_v1  ;;  %77 = vset.pattern.permute.xlu1 %v107_v3  ;;  %s108_s0 = smov [#allocation2]   ;;  %vm57_vm3 = vcmask 0  }
   0x4   :  { %78 = vset.pattern.permute.xlu0 %v107_v3  ;;  %17 = vperm.xlu1 %77, %v13_v2   ;;  %v15_v14 = vand.u32 127, %v14_v10  ;;  %s65_s1 = sshll.u32 %s108_s0, 4  ;;  %s66_s1 = int_to_ptr.vmem [resolvable:$true] %s65_s1 }
   0x5   :  { %s85_s14 = scalar_lea.vmem %s66_s1, 16  ;;  %s89_s15 = scalar_lea.vmem %s66_s1, 32 }
   0x6   :  { %p86_p0 = scmp.ne.s32.totalorder %s66_s1, %s85_s14  ;;  %p90_p1 = scmp.lt.s32.totalorder %s66_s1, %s66_s1 }
   0x7   :  { %p91_p2 = scmp.lt.s32.totalorder %s89_s15, %s85_s14 }
   0x9   :  { %p92_p3 = por %p91_p2, %p90_p1 }
   0xb   :  { %p93_p4 = pnand %p92_p3, %p86_p0 }
  0x7f   :  { %v18_v15 = vpop.permute.xlu1 %17 }
  0x80   :  { %vm19_vm1 = vcmp.eq.s32.totalorder %v15_v14, %v18_v15 }
  0x8c   :  { %v23_v4 = vpop.xlane.xlu0 %22 }
  0x8d   :  { %v24_v5 = vsub.f32 %v12_v0, %v23_v4 }
  0x8f   :  { %v25_v6 = vmul.f32 1.442695, %v24_v5 }
  0x91   :  { %79 = vpow2.f32 %v25_v6 }
  0x9e   :  { %v80_v7 = vpop.eup %79 }
  0x9f   :  { %v27_v8 = vsel %vm20_vm0, %v80_v7, 0.0 }
  0xa0   :  { %28 = vadd.xlane.f32.xlu0 %v27_v8 }
 0x129   :  { %v29_v9 = vpop.xlane.xlu0 %28 }
 0x12a   :  { %81 = vrcp.f32 %v29_v9 }
 0x12b   :  { %83 = vlog2.f32 %v29_v9 }
 0x137   :  { %v82_v11 = vpop.eup %81 }
 0x138   :  { %v84_v12 = vpop.eup %83  ;;  %v35_v13 = vmul.f32 %v82_v11, %v80_v7 }
 0x139   :  { %v31_v17 = vmul.f32 0.6931472, %v84_v12 }
 0x13a   :  { %v36_v16 = vmul.f32 %v35_v13, %v35_v13 }
 0x13b   :  { %v32_v20 = vsub.f32 %v24_v5, %v31_v17 }
 0x13c   :  { %v37_v18 = vmul.f32 %v36_v16, %v36_v16 }
 0x13e   :  { %v38_v19 = vmul.f32 0.003125, %v37_v18 }
 0x140   :  { %v39_v21 = vsel %vm19_vm1, 0.903125, %v38_v19 }
 0x141   :  { %v40_v22 = vmul.f32 %v39_v21, %v32_v20 }
 0x143   :  { %v41_v23 = vsel %vm20_vm0, %v40_v22, 0.0 }
 0x144   :  { %42 = vadd.xlane.f32.xlu1 %v41_v23 }
 0x1cd   :  { %v43_v24 = vpop.xlane.xlu1 %42 }
 0x1ce   :  { %v44_v25 = vsub.f32 0.0, %v43_v24 }
 0x1d0   :  { %v46_v26 = vsel %vm45_vm2, %v44_v25, 0.0 }
 0x1d1   :  { %47 = vadd.xlane.f32.xlu0 %v46_v26 }
 0x25a   :  { %v48_v27 = vpop.xlane.xlu0 %47 }
 0x25b   :  { %v49_v28 = vrot.slane %v48_v27, 4 }
 0x25d   :  { %v50_v29 = vadd.f32 %v49_v28, %v48_v27 }
 0x25f   :  { %v51_v30 = vrot.slane %v50_v29, 2 }
 0x261   :  { %v52_v31 = vadd.f32 %v51_v30, %v50_v29 }
 0x263   :  { %v53_v32 = vrot.slane %v52_v31, 1 }
 0x265   :  { %v54_v33 = vadd.f32 %v53_v32, %v52_v31 }
 0x267   :  { %73 = vpush %v54_v33 }
 0x298   :  { %s74_s13 = spop %73 }
 0x299   :  { %v56_v34 = vstv %s74_s13 }
 0x29a   :  { %58 = vst.msk [vmem:[#allocation2] sm:$0x1] %vm57_vm3, %v56_v34 }
 0x29b   :  { %96 = shalt.err (!%p93_p4)
}
 0x29c   :  { %68 = dma.vmem_to_hbm [thread:$0]  %s66_s1, 16, %s138_s2, [#allocation3]  }
 0x29d   :  { %105 = dma.done.wait [#allocation3], 16  }
 0x29e   :  { %106 = vsyncadd [#allocation3], 4294967280 }
 0x29f   :  { %72 = vsyncpa [#allocation3], 1 }

</bundles_post_ra>
